<compile_context>
chip_gen: v6e
topology: v6e:2x2x1
jax: 0.10.0
libtpu: 0.0.40
codegen_flags: <defaults>
</compile_context>

<pallas_src>
import functools

import jax
import jax.numpy as jnp
from jax.experimental import pallas as pl
from jax.experimental.pallas import tpu as pltpu


def _weighted_mse_partial_kernel(x_ref, t_ref, w_ref, out_ref, *, tb):
    i = pl.program_id(0)

    x = x_ref[...].astype(jnp.float32)                     # (tb, D)
    t = t_ref[...].astype(jnp.float32)                     # (tb, D)
    start = pl.multiple_of(i * tb, 8)
    w = w_ref[pl.ds(start, tb), :].astype(jnp.float32)     # (tb, 1) from resident weights

    d = x - t
    wl = d * d * w                                          # broadcast (tb,1)->(tb,D)

    # Reduce groups of 8 sublanes with plain vreg adds (VPU only). The single
    # cross-lane/sublane reduce + mean scale happens once, outside the kernel.
    part = wl.reshape(tb // 8, 8, wl.shape[-1]).sum(axis=0)  # (8, D)
    out_ref[...] = part


def sample_weighted_mse_loss(x, t, w, *, tb=None):
    """Pallas implementation of SampleWeightedLoss(nn.MSELoss).forward."""
    B, D = x.shape
    assert t.shape == (B, D) and w.shape == (B, 1)

    inv_total = 1.0 / float(B * D)   # mean over the ORIGINAL B*D elements

    # ---- tile sizing: ~1 MiB per input block, rows a multiple of 8 ----
    if tb is None:
        target_bytes = 1 << 20
        tb = (target_bytes // (D * 4)) // 8 * 8
        tb = max(8, min(2048, tb))

    # ---- pad batch so the tile divides it (zero weights => no contribution) ----
    Bp = ((B + 7) // 8) * 8
    tb = min(tb, Bp)
    tb = max(8, (tb // 8) * 8)
    Bp = ((Bp + tb - 1) // tb) * tb
    if Bp != B:
        pad = Bp - B
        x = jnp.pad(x, ((0, pad), (0, 0)))
        t = jnp.pad(t, ((0, pad), (0, 0)))
        w = jnp.pad(w, ((0, pad), (0, 0)))   # zero weight -> zero contribution

    grid = (Bp // tb,)
    kernel = functools.partial(_weighted_mse_partial_kernel, tb=tb)

    partials = pl.pallas_call(
        kernel,
        out_shape=jax.ShapeDtypeStruct((grid[0] * 8, D), jnp.float32),
        grid_spec=pltpu.PrefetchScalarGridSpec(
            num_scalar_prefetch=0,
            grid=grid,
            in_specs=[
                pl.BlockSpec((tb, D), lambda i: (i, 0)),
                pl.BlockSpec((tb, D), lambda i: (i, 0)),
                # Whole weight vector stays resident in VMEM (constant index map
                # => fetched once, no per-step DMA for this tiny array).
                pl.BlockSpec((Bp, 1), lambda i: (0, 0)),
            ],
            out_specs=pl.BlockSpec((8, D), lambda i: (i, 0)),
        ),
        compiler_params=pltpu.CompilerParams(
            dimension_semantics=("parallel",)),   # independent partials -> megacore OK
    )(x, t, w)

    # Tiny final reduction (grid_size*8*D elements) + mean scale in plain JAX.
    return jnp.sum(partials) * jnp.float32(inv_total)


if __name__ == "__main__":
    key = jax.random.PRNGKey(0)
    k1, k2, k3 = jax.random.split(key, 3)

    # Small shapes consistent with the module (batch of feature vectors +
    # per-sample weights that broadcast along the feature axis).
    B, D = 16, 128
    x = jax.random.normal(k1, (B, D), dtype=jnp.float32)    # predictions
    t = jax.random.normal(k2, (B, D), dtype=jnp.float32)    # targets
    w = jax.random.uniform(k3, (B, 1), dtype=jnp.float32)   # per-sample weights

    out = sample_weighted_mse_loss(x, t, w)
    jax.block_until_ready(out)
    ref = jnp.mean(((x - t) ** 2) * w)
    assert jnp.allclose(out, ref, rtol=1e-5, atol=1e-6), (out, ref)

    # Also exercise the ragged-batch (padded) path.
    B2 = 20
    x2 = jax.random.normal(k1, (B2, D), dtype=jnp.float32)
    t2 = jax.random.normal(k2, (B2, D), dtype=jnp.float32)
    w2 = jax.random.uniform(k3, (B2, 1), dtype=jnp.float32)
    out2 = sample_weighted_mse_loss(x2, t2, w2)
    jax.block_until_ready(out2)
    ref2 = jnp.mean(((x2 - t2) ** 2) * w2)
    assert jnp.allclose(out2, ref2, rtol=1e-5, atol=1e-6), (out2, ref2)

    print("KERNEL_OK")
</pallas_src>

<mosaic_0001>
module attributes {stable_mosaic.version = 11 : i64} {
  func.func @_weighted_mse_partial_kernel(%arg0: i32, %arg1: memref<16x128xf32, #tpu.memory_space<vmem>>, %arg2: memref<16x128xf32, #tpu.memory_space<vmem>>, %arg3: memref<16x1xf32, #tpu.memory_space<vmem>>, %arg4: memref<8x128xf32, #tpu.memory_space<vmem>>) attributes {dimension_semantics = [#tpu.dimension_semantics<parallel>], iteration_bounds = array<i64: 1>, scalar_prefetch = 0 : i64, scratch_operands = 0 : i64, tpu.core_type = #tpu.core_type<tc>, window_params = [{transform_indices = @transform_0, window_bounds = array<i64: 16, 128>}, {transform_indices = @transform_1, window_bounds = array<i64: 16, 128>}, {pipeline_mode = #tpu.pipeline_mode<synchronous>, transform_indices = @transform_2, window_bounds = array<i64: 16, 1>}, {transform_indices = @transform_3, window_bounds = array<i64: 8, 128>}]} {
    %c0 = arith.constant 0 : index
    %c0_0 = arith.constant 0 : index
    %0 = vector.load %arg1[%c0, %c0_0] : memref<16x128xf32, #tpu.memory_space<vmem>>, vector<16x128xf32>
    %c0_1 = arith.constant 0 : index
    %c0_2 = arith.constant 0 : index
    %1 = vector.load %arg2[%c0_1, %c0_2] : memref<16x128xf32, #tpu.memory_space<vmem>>, vector<16x128xf32>
    %c16_i32 = arith.constant 16 : i32
    %2 = arith.muli %arg0, %c16_i32 : i32
    %3 = tpu.assume_multiple %2, 8 : i32
    %4 = arith.index_cast %3 : i32 to index
    %c0_3 = arith.constant 0 : index
    %5 = vector.load %arg3[%4, %c0_3] : memref<16x1xf32, #tpu.memory_space<vmem>>, vector<16x1xf32>
    %6 = arith.subf %0, %1 : vector<16x128xf32>
    %7 = arith.mulf %6, %6 : vector<16x128xf32>
    %8 = vector.broadcast %5 : vector<16x1xf32> to vector<16x128xf32>
    %9 = arith.mulf %7, %8 : vector<16x128xf32>
    %10 = vector.shape_cast %9 : vector<16x128xf32> to vector<2x8x128xf32>
    %cst = arith.constant dense<0.000000e+00> : vector<8x128xf32>
    %11 = vector.multi_reduction <add>, %10, %cst [0] : vector<2x8x128xf32> to vector<8x128xf32>
    %c0_4 = arith.constant 0 : index
    %c0_5 = arith.constant 0 : index
    %12 = vector.load %arg4[%c0_4, %c0_5] : memref<8x128xf32, #tpu.memory_space<vmem>>, vector<8x128xf32>
    tpu.vector_store %arg4[%c0_4, %c0_5], %11 {strides = array<i32>} : memref<8x128xf32, #tpu.memory_space<vmem>>, vector<8x128xf32>,
    return
  }
  func.func @transform_0(%arg0: i32) -> (i32, i32) {
    %c0_i32 = arith.constant 0 : i32
    %c0_i32_0 = arith.constant 0 : i32
    return %arg0, %c0_i32 : i32, i32
  }
  func.func @transform_1(%arg0: i32) -> (i32, i32) {
    %c0_i32 = arith.constant 0 : i32
    %c0_i32_0 = arith.constant 0 : i32
    return %arg0, %c0_i32 : i32, i32
  }
  func.func @transform_2(%arg0: i32) -> (i32, i32) {
    %c0_i32 = arith.constant 0 : i32
    %c0_i32_0 = arith.constant 0 : i32
    %c0_i32_1 = arith.constant 0 : i32
    return %c0_i32, %c0_i32_0 : i32, i32
  }
  func.func @transform_3(%arg0: i32) -> (i32, i32) {
    %c0_i32 = arith.constant 0 : i32
    %c0_i32_0 = arith.constant 0 : i32
    return %arg0, %c0_i32 : i32, i32
  }
}

</mosaic_0001>

<bundles_post_ra>
// kernel: tpu_custom_call.1
= control target key start
LH: loop header
LB: loop body
LE: loop exit
PB: predicated region body
PF: predicated region fallthrough
CT: control target
= control target key end

     0   :  { %8 = vsyncpa [#allocation3], 0  ;;  %s163_s0 = inlined_call_operand.vmem [shape: f32[16,128], index: 0, kind: input, shape index: {}]   ;;  %s164_s1 = inlined_call_operand.hbm [shape: f32[16,128], index: 1, kind: input, shape index: {}]   ;;  %s165_s2 = inlined_call_operand.vmem [shape: f32[16,1], index: 2, kind: input, shape index: {}]   ;;  %s166_s3 = inlined_call_operand.hbm [shape: f32[8,128], index: 3, kind: output, shape index: {}]  }
   0x1   :  { %9 = vsyncpa [#allocation4], 0  ;;  %s120_s12 = smov [#allocation2]  }
   0x2   :  { %s17_s13 = sshll.u32 %s120_s12, 4  ;;  %s18_s13 = int_to_ptr.vmem [resolvable:$true] %s17_s13 }
   0x3   :  { %s84_s14 = scalar_lea.vmem %s18_s13, 256  ;;  %p89_p1 = scmp.lt.s32.totalorder %s18_s13, %s18_s13 }
   0x4   :  { %p85_p0 = scmp.ne.s32.totalorder %s18_s13, %s84_s14  ;;  %p90_p2 = scmp.lt.s32.totalorder %s84_s14, %s84_s14 }
   0x6   :  { %p91_p3 = por %p90_p2, %p89_p1 }
   0x8   :  { %p92_p4 = pnand %p91_p3, %p85_p0 }
   0xa   :  { %95 = shalt.err (!%p92_p4)
}
   0xb   :  { %s121_s15 = smov 128   ;;  %s122_s16 = smov 8  }
   0xc   :  { %23 = dma.hbm_to_vmem [thread:$0]  %s164_s1, 256, %s18_s13, [#allocation3], %s121_s15, %s121_s15, %s122_s16  }
   0xd   :  { %116 = dma.done.wait [#allocation3], 256  }
   0xe   :  { %117 = vsyncadd [#allocation3], 4294967040  ;;  %v123_v0 = vmov 0   ;;  %v35_v1 = vld [vmem:[%s165_s2] sm:$0xff]  ;;  %v36_v2 = vld [vmem:[%s165_s2 + $0x8] sm:$0xff]  ;;  %s124_s26 = smov [#allocation5]  }
   0xf   :  { %75 = vset.pattern.permute.xlu0 %v123_v0  ;;  %v29_v3 = vld [vmem:[%s163_s0] sm:$0xff]  ;;  %v30_v5 = vld [vmem:[%s163_s0 + $0x8] sm:$0xff]  ;;  %s61_s27 = sshll.u32 %s124_s26, 4  ;;  %s62_s27 = int_to_ptr.vmem [resolvable:$true] %s61_s27 }
  0x10   :  { %43 = vperm.xlu0 %75, %v35_v1   ;;  %v31_v4 = vld [vmem:[#allocation2] sm:$0xff]  ;;  %v32_v6 = vld [vmem:[#allocation2 + $0x8] sm:$0xff]  ;;  %s96_s2 = scalar_lea.vmem %s62_s27, 128  ;;  %p101_p6 = scmp.lt.s32.totalorder %s62_s27, %s62_s27 }
  0x11   :  { %v37_v7 = vsub.f32 %v29_v3, %v31_v4  ;;  %v38_v8 = vsub.f32 %v30_v5, %v32_v6  ;;  %p97_p5 = scmp.ne.s32.totalorder %s62_s27, %s96_s2  ;;  %p102_p7 = scmp.lt.s32.totalorder %s96_s2, %s96_s2 }
  0x13   :  { %v39_v10 = vmul.f32 %v37_v7, %v37_v7  ;;  %v40_v11 = vmul.f32 %v38_v8, %v38_v8  ;;  %p103_p8 = por %p102_p7, %p101_p6 }
  0x14   :  { %48 = vperm.xlu0 %75, %v36_v2  }
  0x15   :  { %p104_p9 = pnand %p103_p8, %p97_p5 }
  0x8b   :  { %v44_v9 = vpop.permute.xlu0 %43 }
  0x8c   :  { %v51_v13 = vmul.f32 %v44_v9, %v39_v10 }
  0x8f   :  { %v49_v12 = vpop.permute.xlu0 %48 }
  0x90   :  { %v52_v14 = vmul.f32 %v49_v12, %v40_v11 }
  0x92   :  { %v53_v15 = vadd.f32 %v52_v14, %v51_v13 }
  0x94   :  { %54 = vst [vmem:[#allocation5] sm:$0xff] %v53_v15 }
  0x95   :  { %107 = shalt.err (!%p104_p9)
}
  0x96   :  { %64 = dma.vmem_to_hbm [thread:$0]  %s62_s27, 128, %s166_s3, [#allocation4]  }
  0x97   :  { %118 = dma.done.wait [#allocation4], 128  }
  0x98   :  { %119 = vsyncadd [#allocation4], 4294967168 }
  0x99   :  { %68 = vsyncpa [#allocation3], 1 }
  0x9a   :  { %69 = vsyncpa [#allocation4], 1 }

</bundles_post_ra>
